<compile_context>
chip_gen: v6e
topology: v6e:2x2x1
jax: 0.10.0
libtpu: 0.0.40
codegen_flags: <defaults>
</compile_context>

<pallas_src>
import math

import jax
import jax.numpy as jnp
from jax import lax
from jax.experimental import pallas as pl
from jax.experimental.pallas import tpu as pltpu


# ----------------------------------------------------------------------------
# Pallas kernel: per-pixel MLP (BGRXYMLPNet, BN folded) + fused UNet-logit add
# ----------------------------------------------------------------------------
def _mlp_add_kernel(x_ref, u_ref,
                    w1_ref, b1_ref, w2_ref, b2_ref,
                    w3_ref, b3_ref, w4_ref, b4_ref,
                    o_ref):
    x = x_ref[...]                                               # (5, tm) f32

    # layer 1: conv1(1x1)+bn1+relu  (BN folded into w/b)
    h = jnp.dot(w1_ref[...], x, preferred_element_type=jnp.float32)
    h = jnp.maximum(h + b1_ref[...], 0.0)                        # (128, tm)

    # layer 2: conv2(1x1)+bn2+relu
    h = jnp.dot(w2_ref[...], h, preferred_element_type=jnp.float32)
    h = jnp.maximum(h + b2_ref[...], 0.0)                        # (32, tm)

    # layer 3: conv3(1x1)+bn3+relu
    h = jnp.dot(w3_ref[...], h, preferred_element_type=jnp.float32)
    h = jnp.maximum(h + b3_ref[...], 0.0)                        # (32, tm)

    # layer 4: conv4(1x1), no activation; fuse the UNet-branch addition
    o = jnp.dot(w4_ref[...], h, preferred_element_type=jnp.float32)
    o = o + b4_ref[...] + u_ref[...]                             # (2, tm)
    o_ref[...] = o.astype(o_ref.dtype)


def _round_up(a, b):
    return ((a + b - 1) // b) * b


def _fused_mlp_add(x_nchw, unet_logits, mlp_params, *, tm=2048):
    """Returns unet_logits + BGRXYMLPNet(x).  Shapes: (N,5,H,W)->(N,2,H,W)."""
    N, C, H, W = x_nchw.shape
    assert C == 5
    HW = H * W

    # NCHW is already channel-major per sample: free reshapes, no transpose.
    x = x_nchw.reshape(N, C, HW)
    u = unet_logits.reshape(N, 2, HW)

    tm_eff = min(tm, _round_up(HW, 128))
    HW_pad = _round_up(HW, tm_eff)
    if HW_pad != HW:
        x = jnp.pad(x, ((0, 0), (0, 0), (0, HW_pad - HW)))
        u = jnp.pad(u, ((0, 0), (0, 0), (0, HW_pad - HW)))

    (w1, b1), (w2, b2), (w3, b3), (w4, b4) = mlp_params

    def const_spec(shape):
        # Constant index_map: fetched once, resident across the whole grid.
        return pl.BlockSpec(shape, lambda n, j: (0, 0))

    grid = (N, HW_pad // tm_eff)

    flops = 2 * N * HW_pad * (5 * 128 + 128 * 32 + 32 * 32 + 32 * 2)
    bytes_accessed = 4 * N * HW_pad * (5 + 2 + 2)  # x in, unet in, out
    cost = pl.CostEstimate(flops=flops, transcendentals=0,
                           bytes_accessed=bytes_accessed)

    out = pl.pallas_call(
        _mlp_add_kernel,
        out_shape=jax.ShapeDtypeStruct((N, 2, HW_pad), jnp.float32),
        grid_spec=pltpu.PrefetchScalarGridSpec(
            num_scalar_prefetch=0,
            grid=grid,
            in_specs=[
                pl.BlockSpec((None, 5, tm_eff), lambda n, j: (n, 0, j)),  # x
                pl.BlockSpec((None, 2, tm_eff), lambda n, j: (n, 0, j)),  # unet
                const_spec(w1.shape), const_spec(b1.shape),
                const_spec(w2.shape), const_spec(b2.shape),
                const_spec(w3.shape), const_spec(b3.shape),
                const_spec(w4.shape), const_spec(b4.shape),
            ],
            out_specs=pl.BlockSpec((None, 2, tm_eff), lambda n, j: (n, 0, j)),
        ),
        compiler_params=pltpu.CompilerParams(
            dimension_semantics=("parallel", "parallel")),
        cost_estimate=cost,
    )(x, u, w1, b1, w2, b2, w3, b3, w4, b4)

    out = out[:, :, :HW]
    return out.reshape(N, 2, H, W)


# ----------------------------------------------------------------------------
# UNet branch (plain JAX / XLA ops)
# ----------------------------------------------------------------------------
def _conv3x3(x, w):
    return lax.conv_general_dilated(
        x, w, window_strides=(1, 1), padding=((1, 1), (1, 1)),
        dimension_numbers=("NCHW", "OIHW", "NCHW"))


def _bn_relu(x, scale, shift):
    return jnp.maximum(
        x * scale[None, :, None, None] + shift[None, :, None, None], 0.0)


def _double_conv(x, p):
    x = _bn_relu(_conv3x3(x, p["w1"]), p["s1"], p["t1"])
    x = _bn_relu(_conv3x3(x, p["w2"]), p["s2"], p["t2"])
    return x


def _maxpool2(x):
    N, C, H, W = x.shape
    assert H % 2 == 0 and W % 2 == 0
    return x.reshape(N, C, H // 2, 2, W // 2, 2).max(axis=(3, 5))


def _up_block(x1, x2, p):
    # ConvTranspose2d(cin, cin//2, kernel_size=2, stride=2)
    N, C, H, W = x1.shape
    cout_t = p["wt"].shape[1]
    y = jnp.einsum("nchw,coab->nohawb", x1, p["wt"])
    y = y.reshape(N, cout_t, 2 * H, 2 * W) + p["bt"][None, :, None, None]
    dY = x2.shape[2] - y.shape[2]
    dX = x2.shape[3] - y.shape[3]
    if dY or dX:
        y = jnp.pad(y, ((0, 0), (0, 0),
                        (dY // 2, dY - dY // 2), (dX // 2, dX - dX // 2)))
    x = jnp.concatenate([x2, y], axis=1)
    return _double_conv(x, p["dc"])


def unet_forward(x, P):
    x1 = _double_conv(x, P["inc"])
    x2 = _double_conv(_maxpool2(x1), P["down1"])
    x3 = _double_conv(_maxpool2(x2), P["down2"])
    x4 = _double_conv(_maxpool2(x3), P["down3"])
    x5 = _double_conv(_maxpool2(x4), P["down4"])
    y = _up_block(x5, x4, P["up1"])
    y = _up_block(y, x3, P["up2"])
    y = _up_block(y, x2, P["up3"])
    y = _up_block(y, x1, P["up4"])
    y = jnp.einsum("nchw,oc->nohw", y, P["outc_w"])
    y = y + P["outc_b"][None, :, None, None]
    return y


# ----------------------------------------------------------------------------
# Full module forward
# ----------------------------------------------------------------------------
def bgrxy_runet_forward(x_nchw, unet_params, mlp_params, *, tm=2048):
    unet_logits = unet_forward(x_nchw, unet_params)
    return _fused_mlp_add(x_nchw, unet_logits, mlp_params, tm=tm)


# ----------------------------------------------------------------------------
# Parameter init (deterministic, inference-mode BN folded to scale/shift)
# ----------------------------------------------------------------------------
def _bn_fold(key, c, eps=1e-5):
    kg, kb, km, kv = jax.random.split(key, 4)
    gamma = 1.0 + 0.05 * jax.random.normal(kg, (c,), jnp.float32)
    beta = 0.05 * jax.random.normal(kb, (c,), jnp.float32)
    mean = 0.02 * jax.random.normal(km, (c,), jnp.float32)
    var = jnp.abs(1.0 + 0.05 * jax.random.normal(kv, (c,), jnp.float32))
    scale = gamma / jnp.sqrt(var + eps)
    shift = beta - mean * scale
    return scale, shift


def init_mlp_params(key):
    """BGRXYMLPNet params with BN folded; weights (cout,cin), biases (cout,1)."""
    dims = [(5, 128), (128, 32), (32, 32), (32, 2)]
    keys = jax.random.split(key, 3 * len(dims))
    params = []
    for li, (cin, cout) in enumerate(dims):
        kw, kb, kn = keys[3 * li], keys[3 * li + 1], keys[3 * li + 2]
        bound = 1.0 / math.sqrt(cin)
        w = jax.random.uniform(kw, (cout, cin), jnp.float32, -bound, bound)
        b = jax.random.uniform(kb, (cout,), jnp.float32, -bound, bound)
        if li < 3:  # layers 1..3 have BatchNorm -> fold into w/b
            scale, shift = _bn_fold(kn, cout)
            w = w * scale[:, None]
            b = b * scale + shift
        params.append((w, b.reshape(cout, 1)))
    return params


def init_unet_params(key):
    def dc_params(k, cin, cmid, cout):
        k1, k2, k3, k4 = jax.random.split(k, 4)
        w1 = jax.random.normal(k1, (cmid, cin, 3, 3), jnp.float32) \
            * math.sqrt(2.0 / (cin * 9))
        w2 = jax.random.normal(k2, (cout, cmid, 3, 3), jnp.float32) \
            * math.sqrt(2.0 / (cmid * 9))
        s1, t1 = _bn_fold(k3, cmid)
        s2, t2 = _bn_fold(k4, cout)
        return dict(w1=w1, s1=s1, t1=t1, w2=w2, s2=s2, t2=t2)

    def up_params(k, cin, cout):
        k1, k2, k3 = jax.random.split(k, 3)
        chalf = cin // 2
        bound = 1.0 / math.sqrt(chalf * 4)
        wt = jax.random.uniform(k1, (cin, chalf, 2, 2), jnp.float32,
                                -bound, bound)
        bt = jax.random.uniform(k2, (chalf,), jnp.float32, -bound, bound)
        return dict(wt=wt, bt=bt, dc=dc_params(k3, cin, cout, cout))

    keys = jax.random.split(key, 10)
    P = dict(
        inc=dc_params(keys[0], 5, 64, 64),
        down1=dc_params(keys[1], 64, 128, 128),
        down2=dc_params(keys[2], 128, 256, 256),
        down3=dc_params(keys[3], 256, 512, 512),
        down4=dc_params(keys[4], 512, 1024, 1024),
        up1=up_params(keys[5], 1024, 512),
        up2=up_params(keys[6], 512, 256),
        up3=up_params(keys[7], 256, 128),
        up4=up_params(keys[8], 128, 64),
    )
    kw, kb = jax.random.split(keys[9])
    bound = 1.0 / math.sqrt(64)
    P["outc_w"] = jax.random.uniform(kw, (2, 64), jnp.float32, -bound, bound)
    P["outc_b"] = jax.random.uniform(kb, (2,), jnp.float32, -bound, bound)
    return P


# ----------------------------------------------------------------------------
# Plain-JAX reference (same math)
# ----------------------------------------------------------------------------
def mlp_reference(x_nchw, mlp_params):
    N, C, H, W = x_nchw.shape
    (w1, b1), (w2, b2), (w3, b3), (w4, b4) = mlp_params
    h = x_nchw.reshape(N, C, H * W)
    h = jnp.maximum(jnp.einsum("oc,ncm->nom", w1, h) + b1[None], 0.0)
    h = jnp.maximum(jnp.einsum("oc,ncm->nom", w2, h) + b2[None], 0.0)
    h = jnp.maximum(jnp.einsum("oc,ncm->nom", w3, h) + b3[None], 0.0)
    h = jnp.einsum("oc,ncm->nom", w4, h) + b4[None]
    return h.reshape(N, 2, H, W)


def reference_forward(x_nchw, unet_params, mlp_params):
    return unet_forward(x_nchw, unet_params) + mlp_reference(x_nchw, mlp_params)


# ----------------------------------------------------------------------------
if __name__ == "__main__":
    key = jax.random.PRNGKey(0)
    kx, km, ku = jax.random.split(key, 3)

    N, C, H, W = 2, 5, 16, 16
    x = jax.random.normal(kx, (N, C, H, W), jnp.float32)
    mlp_params = init_mlp_params(km)
    unet_params = init_unet_params(ku)

    fwd = jax.jit(lambda xx: bgrxy_runet_forward(xx, unet_params, mlp_params))
    out = jax.block_until_ready(fwd(x))

    ref = jax.block_until_ready(reference_forward(x, unet_params, mlp_params))

    assert out.shape == (N, 2, H, W)
    max_err = float(jnp.max(jnp.abs(out - ref)))
    assert jnp.allclose(out, ref, atol=1e-3, rtol=1e-3), max_err

    print("KERNEL_OK")
</pallas_src>

<mosaic_0001>
module attributes {stable_mosaic.version = 11 : i64} {
  func.func @_mlp_add_kernel(%arg0: i32, %arg1: i32, %arg2: memref<1x5x256xf32, #tpu.memory_space<vmem>>, %arg3: memref<1x2x256xf32, #tpu.memory_space<vmem>>, %arg4: memref<128x5xf32, #tpu.memory_space<vmem>>, %arg5: memref<128x1xf32, #tpu.memory_space<vmem>>, %arg6: memref<32x128xf32, #tpu.memory_space<vmem>>, %arg7: memref<32x1xf32, #tpu.memory_space<vmem>>, %arg8: memref<32x32xf32, #tpu.memory_space<vmem>>, %arg9: memref<32x1xf32, #tpu.memory_space<vmem>>, %arg10: memref<2x32xf32, #tpu.memory_space<vmem>>, %arg11: memref<2x1xf32, #tpu.memory_space<vmem>>, %arg12: memref<1x2x256xf32, #tpu.memory_space<vmem>>) attributes {dimension_semantics = [#tpu.dimension_semantics<parallel>, #tpu.dimension_semantics<parallel>], iteration_bounds = array<i64: 2, 1>, scalar_prefetch = 0 : i64, scratch_operands = 0 : i64, tpu.core_type = #tpu.core_type<tc>, window_params = [{transform_indices = @transform_0, window_bounds = array<i64: 1, 5, 256>}, {transform_indices = @transform_1, window_bounds = array<i64: 1, 2, 256>}, {pipeline_mode = #tpu.pipeline_mode<synchronous>, transform_indices = @transform_2, window_bounds = array<i64: 128, 5>}, {pipeline_mode = #tpu.pipeline_mode<synchronous>, transform_indices = @transform_3, window_bounds = array<i64: 128, 1>}, {pipeline_mode = #tpu.pipeline_mode<synchronous>, transform_indices = @transform_4, window_bounds = array<i64: 32, 128>}, {pipeline_mode = #tpu.pipeline_mode<synchronous>, transform_indices = @transform_5, window_bounds = array<i64: 32, 1>}, {pipeline_mode = #tpu.pipeline_mode<synchronous>, transform_indices = @transform_6, window_bounds = array<i64: 32, 32>}, {pipeline_mode = #tpu.pipeline_mode<synchronous>, transform_indices = @transform_7, window_bounds = array<i64: 32, 1>}, {pipeline_mode = #tpu.pipeline_mode<synchronous>, transform_indices = @transform_8, window_bounds = array<i64: 2, 32>}, {pipeline_mode = #tpu.pipeline_mode<synchronous>, transform_indices = @transform_9, window_bounds = array<i64: 2, 1>}, {transform_indices = @transform_10, window_bounds = array<i64: 1, 2, 256>}]} {
    %c0 = arith.constant 0 : index
    %c0_0 = arith.constant 0 : index
    %c0_1 = arith.constant 0 : index
    %0 = vector.load %arg2[%c0, %c0_0, %c0_1] : memref<1x5x256xf32, #tpu.memory_space<vmem>>, vector<1x5x256xf32>
    %1 = vector.shape_cast %0 : vector<1x5x256xf32> to vector<5x256xf32>
    %c0_2 = arith.constant 0 : index
    %c0_3 = arith.constant 0 : index
    %2 = vector.load %arg4[%c0_2, %c0_3] : memref<128x5xf32, #tpu.memory_space<vmem>>, vector<128x5xf32>
    %cst = arith.constant dense<0.000000e+00> : vector<128x256xf32>
    %3 = tpu.matmul %2, %1, %cst {dimension_numbers = #tpu.dot_dimension_numbers<[1], [0], [0], [1], [0, 0, 1, 1], [], []>} : vector<128x5xf32>, vector<5x256xf32>, vector<128x256xf32> -> vector<128x256xf32>
    %c0_4 = arith.constant 0 : index
    %c0_5 = arith.constant 0 : index
    %4 = vector.load %arg5[%c0_4, %c0_5] : memref<128x1xf32, #tpu.memory_space<vmem>>, vector<128x1xf32>
    %5 = vector.broadcast %4 : vector<128x1xf32> to vector<128x256xf32>
    %6 = arith.addf %3, %5 : vector<128x256xf32>
    %cst_6 = arith.constant 0.000000e+00 : f32
    %7 = vector.broadcast %cst_6 : f32 to vector<128x256xf32>
    %8 = arith.maximumf %6, %7 : vector<128x256xf32>
    %c0_7 = arith.constant 0 : index
    %c0_8 = arith.constant 0 : index
    %9 = vector.load %arg6[%c0_7, %c0_8] : memref<32x128xf32, #tpu.memory_space<vmem>>, vector<32x128xf32>
    %cst_9 = arith.constant dense<0.000000e+00> : vector<32x256xf32>
    %10 = tpu.matmul %9, %8, %cst_9 {dimension_numbers = #tpu.dot_dimension_numbers<[1], [0], [0], [1], [0, 0, 1, 1], [], []>} : vector<32x128xf32>, vector<128x256xf32>, vector<32x256xf32> -> vector<32x256xf32>
    %c0_10 = arith.constant 0 : index
    %c0_11 = arith.constant 0 : index
    %11 = vector.load %arg7[%c0_10, %c0_11] : memref<32x1xf32, #tpu.memory_space<vmem>>, vector<32x1xf32>
    %12 = vector.broadcast %11 : vector<32x1xf32> to vector<32x256xf32>
    %13 = arith.addf %10, %12 : vector<32x256xf32>
    %cst_12 = arith.constant 0.000000e+00 : f32
    %14 = vector.broadcast %cst_12 : f32 to vector<32x256xf32>
    %15 = arith.maximumf %13, %14 : vector<32x256xf32>
    %c0_13 = arith.constant 0 : index
    %c0_14 = arith.constant 0 : index
    %16 = vector.load %arg8[%c0_13, %c0_14] : memref<32x32xf32, #tpu.memory_space<vmem>>, vector<32x32xf32>
    %cst_15 = arith.constant dense<0.000000e+00> : vector<32x256xf32>
    %17 = tpu.matmul %16, %15, %cst_15 {dimension_numbers = #tpu.dot_dimension_numbers<[1], [0], [0], [1], [0, 0, 1, 1], [], []>} : vector<32x32xf32>, vector<32x256xf32>, vector<32x256xf32> -> vector<32x256xf32>
    %c0_16 = arith.constant 0 : index
    %c0_17 = arith.constant 0 : index
    %18 = vector.load %arg9[%c0_16, %c0_17] : memref<32x1xf32, #tpu.memory_space<vmem>>, vector<32x1xf32>
    %19 = vector.broadcast %18 : vector<32x1xf32> to vector<32x256xf32>
    %20 = arith.addf %17, %19 : vector<32x256xf32>
    %cst_18 = arith.constant 0.000000e+00 : f32
    %21 = vector.broadcast %cst_18 : f32 to vector<32x256xf32>
    %22 = arith.maximumf %20, %21 : vector<32x256xf32>
    %c0_19 = arith.constant 0 : index
    %c0_20 = arith.constant 0 : index
    %23 = vector.load %arg10[%c0_19, %c0_20] : memref<2x32xf32, #tpu.memory_space<vmem>>, vector<2x32xf32>
    %cst_21 = arith.constant dense<0.000000e+00> : vector<2x256xf32>
    %24 = tpu.matmul %23, %22, %cst_21 {dimension_numbers = #tpu.dot_dimension_numbers<[1], [0], [0], [1], [0, 0, 1, 1], [], []>} : vector<2x32xf32>, vector<32x256xf32>, vector<2x256xf32> -> vector<2x256xf32>
    %c0_22 = arith.constant 0 : index
    %c0_23 = arith.constant 0 : index
    %25 = vector.load %arg11[%c0_22, %c0_23] : memref<2x1xf32, #tpu.memory_space<vmem>>, vector<2x1xf32>
    %26 = vector.broadcast %25 : vector<2x1xf32> to vector<2x256xf32>
    %27 = arith.addf %24, %26 : vector<2x256xf32>
    %c0_24 = arith.constant 0 : index
    %c0_25 = arith.constant 0 : index
    %c0_26 = arith.constant 0 : index
    %28 = vector.load %arg3[%c0_24, %c0_25, %c0_26] : memref<1x2x256xf32, #tpu.memory_space<vmem>>, vector<1x2x256xf32>
    %29 = vector.shape_cast %28 : vector<1x2x256xf32> to vector<2x256xf32>
    %30 = arith.addf %27, %29 : vector<2x256xf32>
    %c0_27 = arith.constant 0 : index
    %c0_28 = arith.constant 0 : index
    %c0_29 = arith.constant 0 : index
    %31 = vector.load %arg12[%c0_27, %c0_28, %c0_29] : memref<1x2x256xf32, #tpu.memory_space<vmem>>, vector<1x2x256xf32>
    %32 = vector.shape_cast %31 : vector<1x2x256xf32> to vector<2x256xf32>
    %33 = vector.shape_cast %30 : vector<2x256xf32> to vector<1x2x256xf32>
    tpu.vector_store %arg12[%c0_27, %c0_28, %c0_29], %33 {strides = array<i32>} : memref<1x2x256xf32, #tpu.memory_space<vmem>>, vector<1x2x256xf32>,
    return
  }
  func.func @transform_0(%arg0: i32, %arg1: i32) -> (i32, i32, i32) {
    %c0_i32 = arith.constant 0 : i32
    %c0_i32_0 = arith.constant 0 : i32
    return %arg0, %c0_i32, %arg1 : i32, i32, i32
  }
  func.func @transform_1(%arg0: i32, %arg1: i32) -> (i32, i32, i32) {
    %c0_i32 = arith.constant 0 : i32
    %c0_i32_0 = arith.constant 0 : i32
    return %arg0, %c0_i32, %arg1 : i32, i32, i32
  }
  func.func @transform_2(%arg0: i32, %arg1: i32) -> (i32, i32) {
    %c0_i32 = arith.constant 0 : i32
    %c0_i32_0 = arith.constant 0 : i32
    %c0_i32_1 = arith.constant 0 : i32
    return %c0_i32, %c0_i32_0 : i32, i32
  }
  func.func @transform_3(%arg0: i32, %arg1: i32) -> (i32, i32) {
    %c0_i32 = arith.constant 0 : i32
    %c0_i32_0 = arith.constant 0 : i32
    %c0_i32_1 = arith.constant 0 : i32
    return %c0_i32, %c0_i32_0 : i32, i32
  }
  func.func @transform_4(%arg0: i32, %arg1: i32) -> (i32, i32) {
    %c0_i32 = arith.constant 0 : i32
    %c0_i32_0 = arith.constant 0 : i32
    %c0_i32_1 = arith.constant 0 : i32
    return %c0_i32, %c0_i32_0 : i32, i32
  }
  func.func @transform_5(%arg0: i32, %arg1: i32) -> (i32, i32) {
    %c0_i32 = arith.constant 0 : i32
    %c0_i32_0 = arith.constant 0 : i32
    %c0_i32_1 = arith.constant 0 : i32
    return %c0_i32, %c0_i32_0 : i32, i32
  }
  func.func @transform_6(%arg0: i32, %arg1: i32) -> (i32, i32) {
    %c0_i32 = arith.constant 0 : i32
    %c0_i32_0 = arith.constant 0 : i32
    %c0_i32_1 = arith.constant 0 : i32
    return %c0_i32, %c0_i32_0 : i32, i32
  }
  func.func @transform_7(%arg0: i32, %arg1: i32) -> (i32, i32) {
    %c0_i32 = arith.constant 0 : i32
    %c0_i32_0 = arith.constant 0 : i32
    %c0_i32_1 = arith.constant 0 : i32
    return %c0_i32, %c0_i32_0 : i32, i32
  }
  func.func @transform_8(%arg0: i32, %arg1: i32) -> (i32, i32) {
    %c0_i32 = arith.constant 0 : i32
    %c0_i32_0 = arith.constant 0 : i32
    %c0_i32_1 = arith.constant 0 : i32
    return %c0_i32, %c0_i32_0 : i32, i32
  }
  func.func @transform_9(%arg0: i32, %arg1: i32) -> (i32, i32) {
    %c0_i32 = arith.constant 0 : i32
    %c0_i32_0 = arith.constant 0 : i32
    %c0_i32_1 = arith.constant 0 : i32
    return %c0_i32, %c0_i32_0 : i32, i32
  }
  func.func @transform_10(%arg0: i32, %arg1: i32) -> (i32, i32, i32) {
    %c0_i32 = arith.constant 0 : i32
    %c0_i32_0 = arith.constant 0 : i32
    return %arg0, %c0_i32, %arg1 : i32, i32, i32
  }
}

</mosaic_0001>

<bundles_post_ra>
// kernel: _lambda_.1
= control target key start
LH: loop header
LB: loop body
LE: loop exit
PB: predicated region body
PF: predicated region fallthrough
CT: control target
= control target key end

     0   :  { %s1423_s13 = smov 0   ;;  %s1425_s14 = smov 0   ;;  %s1707_s0 = inlined_call_operand.vmem [shape: f32[2,5,256], index: 0, kind: input, shape index: {}]   ;;  %s1708_s1 = inlined_call_operand.vmem [shape: f32[2,2,256], index: 1, kind: input, shape index: {}]   ;;  %s1709_s2 = inlined_call_operand.vmem [shape: f32[128,5], index: 2, kind: input, shape index: {}]   ;;  %s1710_s3 = inlined_call_operand.vmem [shape: f32[128,1], index: 3, kind: input, shape index: {}]   ;;  %s1711_s4 = inlined_call_operand.vmem [shape: f32[32,128], index: 4, kind: input, shape index: {}]   ;;  %s1712_s5 = inlined_call_operand.vmem [shape: f32[32,1], index: 5, kind: input, shape index: {}]   ;;  %s1713_s6 = inlined_call_operand.vmem [shape: f32[32,32], index: 6, kind: input, shape index: {}]   ;;  %s1714_s7 = inlined_call_operand.vmem [shape: f32[32,1], index: 7, kind: input, shape index: {}]   ;;  %s1715_s8 = inlined_call_operand.vmem [shape: f32[2,32], index: 8, kind: input, shape index: {}]   ;;  %s1716_s9 = inlined_call_operand.vmem [shape: f32[2,1], index: 9, kind: input, shape index: {}]   ;;  %s1717_s10 = inlined_call_operand.vmem [shape: f32[2,2,256], index: 10, kind: output, shape index: {}]  }
   0x1   :  { %s1427_s15 = smov 0  }
   0x2 LB: > { %s32_s16 = sadd.s32 1, %s1360_s14  ;;  %p1277_p0 = scmp.ge.s32.totalorder %s1364_s15, 1  ;;  %s1364_s15 = sphi %s1427_s15, %s20_s15   ;;  %s1360_s14 = sphi %s1425_s14, %s1719_s14   ;;  %s1356_s13 = sphi %s1423_s13, %s1718_s13  }
   0x3   : > { %p34_p1 = scmp.ge.s32.totalorder %s32_s16, 2  ;;  %p350_p2 = scmp.lt.s32.totalorder %s1364_s15, 3 }
   0x5   : > { %s1721_s16 = smov (%p34_p1, %s32_s16), 0  ;;  %p351_p3 = pnand %p1277_p0, %p350_p2 }
   0x6   : > { %p406_p4 = scmp.lt.s32.totalorder (!%p351_p3), %s1356_s13, 1 }
   0x7   : > { %354 = sbr.rel (%p351_p3) target bundleno = 949 (0x3b5), region = 60 }
   0xc   : > { %v1366_v0 = vmov 0.0   ;;  %s1723_s13 = smov (!%p406_p4, %s1356_s13), 1  ;;  %v1367_v1 = vmov 0   ;;  %vm598_vm0 = vcmask 1044480   ;;  %v466_v2 = vld [vmem:[%s1710_s3 + $0x68] sm:$0xff]  ;;  %v468_v3 = vld [vmem:[%s1710_s3 + $0x78] sm:$0xff] }
   0xd   : > { %669 = vmatprep.mubr.f32.mxu0 %v1366_v0  ;;  %890 = vmatprep.mubr.f32.mxu1 %v1366_v0  ;;  %s1311_s17 = sshll.u32 %s1723_s13, 4  ;;  %v437_v4 = vld [vmem:[%s1709_s2] sm:$0xff]  ;;  %vm549_vm1 = vcmask 39936   ;;  %v467_v8 = vld [vmem:[%s1710_s3 + $0x70] sm:$0xff]  ;;  %v438_v9 = vld [vmem:[%s1709_s2 + $0x8] sm:$0xff]  ;;  %vm951_vm2 = vcmask 261120  }
   0xe   : > { %1341 = vset.pattern.permute.xlu1 %v1367_v1  ;;  %1340 = vset.pattern.permute.xlu0 %v1367_v1  ;;  %s413_s24 = scalar_lea.vmem %s1707_s0, %s1311_s17  ;;  %v465_v7 = vld [vmem:[%s1710_s3 + $0x60] sm:$0xff]  ;;  %v463_v10 = vld [vmem:[%s1710_s3 + $0x50] sm:$0xff]  ;;  %v464_v11 = vld [vmem:[%s1710_s3 + $0x58] sm:$0xff]  ;;  %s1312_s25 = sshll.u32 %s1723_s13, 2 }
   0xf   : > { %536 = vperm.xlu1 %1341, %v466_v2   ;;  %546 = vperm.xlu0 %1340, %v468_v3   ;;  %v436_v5 = vld [vmem:[%s413_s24 + $0x8] sm:$0x1f]  ;;  %v435_v6 = vld [vmem:[%s413_s24] sm:$0x1f]  ;;  %v439_v12 = vld [vmem:[%s1709_s2 + $0x10] sm:$0xff]  ;;  %s423_s28 = scalar_lea.vmem %s1708_s1, %s1312_s25  ;;  %s433_s11 = scalar_lea.vmem %s1717_s10, %s1312_s25 }
  0x10   : > { %1284 = vmatprep.subr.msk.mxu0 %vm598_vm0, %v436_v5  ;;  %v461_v13 = vld [vmem:[%s1710_s3 + $0x40] sm:$0xff]  ;;  %v462_v14 = vld [vmem:[%s1710_s3 + $0x48] sm:$0xff]  ;;  %v440_v15 = vld [vmem:[%s1709_s2 + $0x18] sm:$0xff] }
  0x11   : > { %1285 = vmatpush1.msk.msra.mxu0 %vm598_vm0, %v435_v6  ;;  %v459_v16 = vld [vmem:[%s1710_s3 + $0x30] sm:$0xff]  ;;  %v460_v17 = vld [vmem:[%s1710_s3 + $0x38] sm:$0xff]  ;;  %v441_v18 = vld [vmem:[%s1709_s2 + $0x20] sm:$0xff] }
  0x12   : > { %1286 = vmatmul.mubr.msk.f32.vlgmr.msra.gmra.mxu0 %vm549_vm1, %v437_v4  ;;  %v457_v19 = vld [vmem:[%s1710_s3 + $0x20] sm:$0xff]  ;;  %v458_v20 = vld [vmem:[%s1710_s3 + $0x28] sm:$0xff]  ;;  %v455_v22 = vld [vmem:[%s1710_s3 + $0x10] sm:$0xff] }
  0x13   : > { %531 = vperm.xlu1 %1341, %v465_v7   ;;  %675 = vmatprep.mubr.f32.mxu0 %v1366_v0  ;;  %v442_v21 = vld [vmem:[%s1709_s2 + $0x28] sm:$0xff]  ;;  %v456_v23 = vld [vmem:[%s1710_s3 + $0x18] sm:$0xff]  ;;  %v443_v24 = vld [vmem:[%s1709_s2 + $0x30] sm:$0xff] }
  0x14   : > { %541 = vperm.xlu0 %1340, %v467_v8   ;;  %v453_v25 = vld [vmem:[%s1710_s3] sm:$0xff]  ;;  %v454_v26 = vld [vmem:[%s1710_s3 + $0x8] sm:$0xff]  ;;  %v444_v27 = vld [vmem:[%s1709_s2 + $0x38] sm:$0xff] }
  0x15   : > { %v804_v28 = vld [vmem:[%s1712_s5 + $0x10] sm:$0xff]  ;;  %v805_v29 = vld [vmem:[%s1712_s5 + $0x18] sm:$0xff]  ;;  %v445_v30 = vld [vmem:[%s1709_s2 + $0x40] sm:$0xff] }
  0x16   : > { %1287 = vmatmul.mubr.msk.f32.gmra.mxu0 %vm549_vm1, %v438_v9  ;;  %v802_v31 = vld [vmem:[%s1712_s5] sm:$0xff]  ;;  %v803_v32 = vld [vmem:[%s1712_s5 + $0x8] sm:$0xff]  ;;  %v929_v34 = vld [vmem:[%s1714_s7 + $0x10] sm:$0xff] }
  0x17   : > { %521 = vperm.xlu1 %1341, %v463_v10   ;;  %681 = vmatprep.mubr.f32.mxu0 %v1366_v0  ;;  %v446_v33 = vld [vmem:[%s1709_s2 + $0x48] sm:$0xff]  ;;  %v930_v35 = vld [vmem:[%s1714_s7 + $0x18] sm:$0xff]  ;;  %v447_v36 = vld [vmem:[%s1709_s2 + $0x50] sm:$0xff] }
  0x18   : > { %526 = vperm.xlu0 %1340, %v464_v11   ;;  %v927_v37 = vld [vmem:[%s1714_s7] sm:$0xff]  ;;  %v928_v38 = vld [vmem:[%s1714_s7 + $0x8] sm:$0xff]  ;;  %v448_v39 = vld [vmem:[%s1709_s2 + $0x58] sm:$0xff] }
  0x19   : > { %v1062_v40 = vld [vmem:[%s1716_s9] sm:$0x3]  ;;  %v450_v42 = vld [vmem:[%s1709_s2 + $0x68] sm:$0xff]  ;;  %v451_v43 = vld [vmem:[%s1709_s2 + $0x70] sm:$0xff] }
  0x1a   : > { %1288 = vmatmul.mubr.msk.f32.gmra.mxu0 %vm549_vm1, %v439_v12  ;;  %v449_v41 = vld [vmem:[%s1709_s2 + $0x60] sm:$0xff]  ;;  %v452_v44 = vld [vmem:[%s1709_s2 + $0x78] sm:$0xff] }
  0x1b   : > { %511 = vperm.xlu1 %1341, %v461_v13   ;;  %687 = vmatprep.mubr.f32.mxu0 %v1366_v0 }
  0x1c   : > { %516 = vperm.xlu0 %1340, %v462_v14  }
  0x1e   : > { %1289 = vmatmul.mubr.msk.f32.gmra.mxu0 %vm549_vm1, %v440_v15 }
  0x1f   : > { %501 = vperm.xlu1 %1341, %v459_v16   ;;  %693 = vmatprep.mubr.f32.mxu0 %v1366_v0 }
  0x20   : > { %506 = vperm.xlu0 %1340, %v460_v17  }
  0x22   : > { %1290 = vmatmul.mubr.msk.f32.gmra.mxu0 %vm549_vm1, %v441_v18 }
  0x23   : > { %491 = vperm.xlu1 %1341, %v457_v19   ;;  %699 = vmatprep.mubr.f32.mxu0 %v1366_v0 }
  0x24   : > { %496 = vperm.xlu0 %1340, %v458_v20  }
  0x26   : > { %1291 = vmatmul.mubr.msk.f32.gmra.mxu0 %vm549_vm1, %v442_v21 }
  0x27   : > { %481 = vperm.xlu1 %1341, %v455_v22   ;;  %705 = vmatprep.mubr.f32.mxu0 %v1366_v0 }
  0x28   : > { %486 = vperm.xlu0 %1340, %v456_v23  }
  0x2a   : > { %1292 = vmatmul.mubr.msk.f32.gmra.mxu0 %vm549_vm1, %v443_v24 }
  0x2b   : > { %471 = vperm.xlu1 %1341, %v453_v25   ;;  %711 = vmatprep.mubr.f32.mxu0 %v1366_v0 }
  0x2c   : > { %476 = vperm.xlu0 %1340, %v454_v26  }
  0x2e   : > { %1293 = vmatmul.mubr.msk.f32.gmra.mxu0 %vm549_vm1, %v444_v27 }
  0x2f   : > { %818 = vperm.xlu1 %1341, %v804_v28   ;;  %717 = vmatprep.mubr.f32.mxu0 %v1366_v0 }
  0x30   : > { %823 = vperm.xlu0 %1340, %v805_v29  }
  0x32   : > { %1294 = vmatmul.mubr.msk.f32.gmra.mxu0 %vm549_vm1, %v445_v30 }
  0x33   : > { %808 = vperm.xlu1 %1341, %v802_v31   ;;  %723 = vmatprep.mubr.f32.mxu0 %v1366_v0 }
  0x34   : > { %813 = vperm.xlu0 %1340, %v803_v32  }
  0x36   : > { %1295 = vmatmul.mubr.msk.f32.gmra.mxu0 %vm549_vm1, %v446_v33 }
  0x37   : > { %943 = vperm.xlu1 %1341, %v929_v34   ;;  %729 = vmatprep.mubr.f32.mxu0 %v1366_v0 }
  0x38   : > { %948 = vperm.xlu0 %1340, %v930_v35  }
  0x3a   : > { %1296 = vmatmul.mubr.msk.f32.gmra.mxu0 %vm549_vm1, %v447_v36 }
  0x3b   : > { %933 = vperm.xlu1 %1341, %v927_v37   ;;  %735 = vmatprep.mubr.f32.mxu0 %v1366_v0 }
  0x3c   : > { %938 = vperm.xlu0 %1340, %v928_v38  }
  0x3e   : > { %1297 = vmatmul.mubr.msk.f32.gmra.mxu0 %vm549_vm1, %v448_v39 }
  0x3f   : > { %741 = vmatprep.mubr.f32.mxu0 %v1366_v0 }
  0x40   : > { %1065 = vperm.xlu0 %1340, %v1062_v40  }
  0x42   : > { %1298 = vmatmul.mubr.msk.f32.gmra.mxu0 %vm549_vm1, %v449_v41 }
  0x43   : > { %747 = vmatprep.mubr.f32.mxu0 %v1366_v0 }
  0x46   : > { %1299 = vmatmul.mubr.msk.f32.gmra.mxu0 %vm549_vm1, %v450_v42 }
  0x47   : > { %753 = vmatprep.mubr.f32.mxu0 %v1366_v0 }
  0x4a   : > { %1300 = vmatmul.mubr.msk.f32.gmra.mxu0 %vm549_vm1, %v451_v43 }
  0x4b   : > { %759 = vmatprep.mubr.f32.mxu0 %v1366_v0 }
  0x4e   : > { %1301 = vmatmul.mubr.msk.f32.gmra.mxu0 %vm549_vm1, %v452_v44 }
  0x8a   : > { %v547_v5 = vpop.permute.xlu0 %546  ;;  %v537_v7 = vpop.permute.xlu1 %536 }
  0x8e   : > { %v532_v12 = vpop.permute.xlu1 %531 }
  0x8f   : > { %v542_v10 = vpop.permute.xlu0 %541 }
  0x92   : > { %v522_v17 = vpop.permute.xlu1 %521 }
  0x93   : > { %v527_v15 = vpop.permute.xlu0 %526 }
  0x96   : > { %v512_v25 = vpop.permute.xlu1 %511 }
  0x97   : > { %v517_v21 = vpop.permute.xlu0 %516 }
  0x9a   : > { %v502_v39 = vpop.permute.xlu1 %501 }
  0x9b   : > { %v507_v34 = vpop.permute.xlu0 %506 }
  0xd2   : > { %v1603_v45 = vpop.f32.mrf.mxu0 }
  0xd4   : > { %v1605_v46 = vpop.f32.mrf.mxu0 }
  0xd6   : > { %v1607_v47 = vpop.f32.mrf.mxu0 }
  0xd8   : > { %v1609_v48 = vpop.f32.mrf.mxu0 }
  0xda   : > { %v1611_v49 = vpop.f32.mrf.mxu0 }
  0xdc   : > { %v1613_v50 = vpop.f32.mrf.mxu0 }
  0xde   : > { %v1615_v51 = vpop.f32.mrf.mxu0 }
  0xe0   : > { %v1617_v52 = vpop.f32.mrf.mxu0 }
  0xe2   : > { %v1619_v53 = vpop.f32.mrf.mxu0 }
  0xe4   : > { %v1621_v54 = vpop.f32.mrf.mxu0 }
  0xe6   : > { %v1623_v55 = vpop.f32.mrf.mxu0 }
  0xe8   : > { %v1625_v56 = vpop.f32.mrf.mxu0 }
  0xea   : > { %v1627_v57 = vpop.f32.mrf.mxu0 }
  0xec   : > { %v1629_v58 = vpop.f32.mrf.mxu0 }
  0xee   : > { %v1631_v59 = vpop.f32.mrf.mxu0 }
  0xf0   : > { %v1633_v60 = vpop.f32.mrf.mxu0 }
  0xf2   : > { %v719_v61 = vpop.f32.mrf.mxu0 }
  0xf4   : > { %v721_v62 = vpop.f32.mrf.mxu0 }
  0xf6   : > { %v725_v63 = vpop.f32.mrf.mxu0 }
  0xf8   : > { %v727_v1 = vpop.f32.mrf.mxu0 }
  0xf9   : > { %v728_v44 = vadd.f32 %v727_v1, %v517_v21 }
  0xfa   : > { %v731_v2 = vpop.f32.mrf.mxu0 }
  0xfb   : > { %v732_v42 = vadd.f32 %v731_v2, %v522_v17  ;;  %v714_v2 = vadd.f32 %v1631_v59, %v507_v34 }
  0xfc   : > { %v733_v3 = vpop.f32.mrf.mxu0 }
  0xfd   : > { %v734_v40 = vadd.f32 %v733_v3, %v522_v17  ;;  %v716_v3 = vadd.f32 %v1633_v60, %v507_v34  ;;  %v801_v34 = vld [vmem:[%s1711_s4 + $0x18] sm:$0xff] }
  0xfe   : > { %v737_v4 = vpop.f32.mrf.mxu0 }
  0xff   : > { %v738_v37 = vadd.f32 %v737_v4, %v527_v15  ;;  %v720_v4 = vadd.f32 %v719_v61, %v512_v25  ;;  %v781_v17 = vmax.f32 %v716_v3, 0.0 }
 0x100   : > { %v739_v6 = vpop.f32.mrf.mxu0 }
 0x101   : > { %v740_v35 = vadd.f32 %v739_v6, %v527_v15  ;;  %v722_v6 = vadd.f32 %v721_v62, %v512_v25  ;;  %v708_v62 = vadd.f32 %v1627_v57, %v502_v39  ;;  %v782_v15 = vmax.f32 %v720_v4, 0.0 }
 0x102   : > { %v743_v8 = vpop.f32.mrf.mxu0 }
 0x103   : > { %v744_v32 = vadd.f32 %v743_v8, %v532_v12  ;;  %v788_v8 = vmax.f32 %v738_v37, 0.0 }
 0x104   : > { %v745_v9 = vpop.f32.mrf.mxu0 }
 0x105   : > { %v746_v30 = vadd.f32 %v745_v9, %v532_v12  ;;  %v790_v43 = vmax.f32 %v744_v32, 0.0  ;;  %v497_v9 = vpop.permute.xlu0 %496  ;;  %v492_v12 = vpop.permute.xlu1 %491 }
 0x106   : > { %v749_v11 = vpop.f32.mrf.mxu0  ;;  %v702_v60 = vadd.f32 %v1623_v55, %v497_v9 }
 0x107   : > { %v750_v28 = vadd.f32 %v749_v11, %v537_v7  ;;  %v791_v41 = vmax.f32 %v746_v30, 0.0  ;;  %v786_v11 = vmax.f32 %v732_v42, 0.0 }
 0x108   : > { %v751_v13 = vpop.f32.mrf.mxu0 }
 0x109   : > { %v752_v26 = vadd.f32 %v751_v13, %v537_v7  ;;  %v792_v38 = vmax.f32 %v750_v28, 0.0  ;;  %v726_v7 = vadd.f32 %v725_v63, %v517_v21  ;;  %v785_v13 = vmax.f32 %v728_v44, 0.0  ;;  %v487_v61 = vpop.permute.xlu0 %486  ;;  %v482_v59 = vpop.permute.xlu1 %481 }
 0x10a   : > { %v755_v14 = vpop.f32.mrf.mxu0  ;;  %v710_v63 = vadd.f32 %v1629_v58, %v502_v39  ;;  %v696_v58 = vadd.f32 %v1619_v53, %v492_v12  ;;  %v778_v21 = vmax.f32 %v708_v62, 0.0  ;;  %v692_v57 = vadd.f32 %v1617_v52, %v487_v61 }
 0x10b   : > { %v756_v24 = vadd.f32 %v755_v14, %v542_v10  ;;  %v793_v36 = vmax.f32 %v752_v26, 0.0  ;;  %v784_v1 = vmax.f32 %v726_v7, 0.0  ;;  %v783_v14 = vmax.f32 %v722_v6, 0.0 }
 0x10c   : > { %v757_v16 = vpop.f32.mrf.mxu0  ;;  %v774_v26 = vmax.f32 %v696_v58, 0.0  ;;  %v773_v28 = vmax.f32 %v692_v57, 0.0 }
 0x10d   : > { %v758_v22 = vadd.f32 %v757_v16, %v542_v10  ;;  %v794_v33 = vmax.f32 %v756_v24, 0.0  ;;  %v787_v10 = vmax.f32 %v734_v40, 0.0  ;;  %v704_v16 = vadd.f32 %v1625_v56, %v497_v9  ;;  %v477_v55 = vpop.permute.xlu0 %476  ;;  %v472_v53 = vpop.permute.xlu1 %471 }
 0x10e   : > { %v761_v18 = vpop.f32.mrf.mxu0  ;;  %v690_v56 = vadd.f32 %v1615_v51, %v487_v61  ;;  %v686_v24 = vadd.f32 %v1613_v50, %v482_v59  ;;  %v678_v52 = vadd.f32 %v1607_v47, %v477_v55  ;;  %v674_v51 = vadd.f32 %v1605_v46, %v472_v53  ;;  %v798_v47 = vld [vmem:[%s1711_s4] sm:$0xff]  ;;  %v800_v46 = vld [vmem:[%s1711_s4 + $0x10] sm:$0xff] }
 0x10f   : > { %v762_v19 = vadd.f32 %v761_v18, %v547_v5  ;;  %v795_v31 = vmax.f32 %v758_v22, 0.0  ;;  %v780_v18 = vmax.f32 %v714_v2, 0.0  ;;  %v777_v22 = vmax.f32 %v704_v16, 0.0  ;;  %v923_v16 = vld [vmem:[%s1713_s6] sm:$0xff] }
 0x110   : > { %v763_v20 = vpop.f32.mrf.mxu0  ;;  %v771_v30 = vmax.f32 %v686_v24, 0.0  ;;  %v672_v50 = vadd.f32 %v1603_v45, %v472_v53  ;;  %v768_v32 = vmax.f32 %v678_v52, 0.0  ;;  %v799_v45 = vld [vmem:[%s1711_s4 + $0x8] sm:$0xff] }
 0x111   : > { %v764_v23 = vadd.f32 %v763_v20, %v547_v5  ;;  %v796_v29 = vmax.f32 %v762_v19, 0.0  ;;  %v789_v5 = vmax.f32 %v740_v35, 0.0  ;;  %v698_v19 = vadd.f32 %v1621_v54, %v492_v12  ;;  %v824_v40 = vpop.permute.xlu0 %823  ;;  %v819_v42 = vpop.permute.xlu1 %818 }
 0x112   : > { %v779_v20 = vmax.f32 %v710_v63, 0.0  ;;  %v684_v54 = vadd.f32 %v1611_v49, %v482_v59 }
 0x113   : > { %v797_v27 = vmax.f32 %v764_v23, 0.0  ;;  %v776_v23 = vmax.f32 %v702_v60, 0.0  ;;  %v775_v25 = vmax.f32 %v698_v19, 0.0  ;;  %v925_v60 = vld [vmem:[%s1713_s6 + $0x10] sm:$0xff] }
 0x115   : > { %826 = vmatprep.subr.mxu1 %v797_v27  ;;  %v680_v27 = vadd.f32 %v1609_v48, %v477_v55  ;;  %v766_v48 = vmax.f32 %v672_v50, 0.0  ;;  %v814_v9 = vpop.permute.xlu0 %813 }
 0x116   : > { %827 = vmatpush1.msra.mxu1 %v796_v29  ;;  %v772_v29 = vmax.f32 %v690_v56, 0.0 }
 0x117   : > { %828 = vmatprep.subr.mxu1 %v795_v31  ;;  %v770_v31 = vmax.f32 %v684_v54, 0.0  ;;  %v769_v49 = vmax.f32 %v680_v27, 0.0 }
 0x118   : > { %829 = vmatpush1.msra.mxu1 %v794_v33  ;;  %v767_v33 = vmax.f32 %v674_v51, 0.0 }
 0x119   : > { %830 = vmatprep.subr.mxu1 %v793_v36  ;;  %v949_v57 = vpop.permute.xlu0 %948 }
 0x11a   : > { %831 = vmatpush1.msra.mxu1 %v792_v38 }
 0x11b   : > { %832 = vmatprep.subr.mxu1 %v791_v41 }
 0x11c   : > { %833 = vmatpush1.msra.mxu1 %v790_v43 }
 0x11d   : > { %834 = vmatprep.subr.mxu1 %v789_v5 }
 0x11e   : > { %835 = vmatpush1.msra.mxu1 %v788_v8 }
 0x11f   : > { %836 = vmatprep.subr.mxu1 %v787_v10 }
 0x120   : > { %837 = vmatpush1.msra.mxu1 %v786_v11  ;;  %v809_v11 = vpop.permute.xlu1 %808 }
 0x121   : > { %838 = vmatprep.subr.mxu1 %v785_v13 }
 0x122   : > { %839 = vmatpush1.msra.mxu1 %v784_v1 }
 0x123   : > { %840 = vmatprep.subr.mxu1 %v783_v14 }
 0x124   : > { %841 = vmatpush1.msra.mxu1 %v782_v15  ;;  %v944_v56 = vpop.permute.xlu1 %943 }
 0x125   : > { %842 = vmatprep.subr.mxu1 %v781_v17  ;;  %v924_v17 = vld [vmem:[%s1713_s6 + $0x8] sm:$0xff] }
 0x126   : > { %843 = vmatpush1.msra.mxu1 %v780_v18  ;;  %v926_v18 = vld [vmem:[%s1713_s6 + $0x18] sm:$0xff] }
 0x127   : > { %844 = vmatprep.subr.mxu1 %v779_v20 }
 0x128   : > { %845 = vmatpush1.msra.mxu1 %v778_v21  ;;  %v934_v52 = vpop.permute.xlu1 %933 }
 0x129   : > { %846 = vmatprep.subr.mxu1 %v777_v22 }
 0x12a   : > { %847 = vmatpush1.msra.mxu1 %v776_v23 }
 0x12b   : > { %848 = vmatprep.subr.mxu1 %v775_v25 }
 0x12c   : > { %849 = vmatpush1.msra.mxu1 %v774_v26  ;;  %v939_v26 = vpop.permute.xlu0 %938 }
 0x12d   : > { %850 = vmatprep.subr.mxu1 %v773_v28 }
 0x12e   : > { %851 = vmatpush1.msra.mxu1 %v772_v29 }
 0x12f   : > { %852 = vmatprep.subr.mxu1 %v771_v30 }
 0x130   : > { %853 = vmatpush1.msra.mxu1 %v770_v31 }
 0x131   : > { %854 = vmatprep.subr.mxu1 %v769_v49 }
 0x132   : > { %855 = vmatpush1.msra.mxu1 %v768_v32 }
 0x133   : > { %856 = vmatprep.subr.mxu1 %v767_v33 }
 0x134   : > { %857 = vmatpush1.msra.mxu1 %v766_v48 }
 0x135   : > { %891 = vmatmul.mubr.f32.vlgmr.msra.gmra.mxu1 %v798_v47  ;;  %v1061_v47 = vld [vmem:[%s1715_s8] sm:$0x3] }
 0x136   : > { %896 = vmatprep.mubr.f32.mxu1 %v1366_v0 }
 0x139   : > { %897 = vmatmul.mubr.f32.gmra.mxu1 %v799_v45  ;;  %v1307_v45 = vld.sshfl [vmem:[%s423_s28] sm:$0x33 pattern:$0x76325410] }
 0x13a   : > { %902 = vmatprep.mubr.f32.mxu1 %v1366_v0 }
 0x13d   : > { %903 = vmatmul.mubr.f32.gmra.mxu1 %v800_v46  ;;  %v1066_v46 = vpop.permute.xlu0 %1065 }
 0x13e   : > { %908 = vmatprep.mubr.f32.mxu1 %v1366_v0 }
 0x141   : > { %909 = vmatmul.mubr.f32.gmra.mxu1 %v801_v34 }
 0x142   : > { %1028 = vmatprep.mubr.f32.mxu1 %v1366_v0 }
 0x1f5   : > { %v892_v35 = vpop.f32.mrf.mxu1 }
 0x1f6   : > { %v893_v1 = vadd.f32 %v892_v35, %v809_v11 }
 0x1f7   : > { %v894_v36 = vpop.f32.mrf.mxu1 }
 0x1f8   : > { %v895_v13 = vadd.f32 %v894_v36, %v809_v11  ;;  %v915_v61 = vmax.f32 %v893_v1, 0.0  ;;  %v1151_v36 = vcombine.high %v1307_v45, %v1307_v45 }
 0x1f9   : > { %v898_v37 = vpop.f32.mrf.mxu1 }
 0x1fa   : > { %v899_v12 = vadd.f32 %v898_v37, %v814_v9  ;;  %v916_v15 = vmax.f32 %v895_v13, 0.0 }
 0x1fb   : > { %v900_v38 = vpop.f32.mrf.mxu1 }
 0x1fc   : > { %v901_v10 = vadd.f32 %v900_v38, %v814_v9  ;;  %v917_v62 = vmax.f32 %v899_v12, 0.0 }
 0x1fd   : > { %v904_v39 = vpop.f32.mrf.mxu1 }
 0x1fe   : > { %v905_v6 = vadd.f32 %v904_v39, %v819_v42  ;;  %v918_v14 = vmax.f32 %v901_v10, 0.0 }
 0x1ff   : > { %v906_v41 = vpop.f32.mrf.mxu1 }
 0x200   : > { %v907_v7 = vadd.f32 %v906_v41, %v819_v42  ;;  %v919_v63 = vmax.f32 %v905_v6, 0.0 }
 0x201   : > { %v910_v43 = vpop.f32.mrf.mxu1 }
 0x202   : > { %v911_v44 = vadd.f32 %v910_v43, %v824_v40  ;;  %v920_v2 = vmax.f32 %v907_v7, 0.0 }
 0x203   : > { %v912_v5 = vpop.f32.mrf.mxu1 }
 0x204   : > { %v913_v8 = vadd.f32 %v912_v5, %v824_v40  ;;  %v921_v3 = vmax.f32 %v911_v44, 0.0 }
 0x206   : > { %v922_v4 = vmax.f32 %v913_v8, 0.0 }
 0x208   : > { %988 = vmatprep.subr.mxu1 %v922_v4 }
 0x209   : > { %989 = vmatpush1.msra.mxu1 %v921_v3 }
 0x20a   : > { %990 = vmatprep.subr.mxu1 %v920_v2 }
 0x20b   : > { %991 = vmatpush1.msra.mxu1 %v919_v63 }
 0x20c   : > { %992 = vmatprep.subr.mxu1 %v918_v14 }
 0x20d   : > { %993 = vmatpush1.msra.mxu1 %v917_v62 }
 0x20e   : > { %994 = vmatprep.subr.mxu1 %v916_v15 }
 0x20f   : > { %995 = vmatpush1.msra.mxu1 %v915_v61 }
 0x210   : > { %1302 = vmatmul.mubr.msk.f32.vlgmr.msra.gmra.mxu1 %vm951_vm2, %v923_v16 }
 0x211   : > { %1034 = vmatprep.mubr.f32.mxu1 %v1366_v0 }
 0x214   : > { %1303 = vmatmul.mubr.msk.f32.gmra.mxu1 %vm951_vm2, %v924_v17 }
 0x215   : > { %1040 = vmatprep.mubr.f32.mxu1 %v1366_v0 }
 0x218   : > { %1304 = vmatmul.mubr.msk.f32.gmra.mxu1 %vm951_vm2, %v925_v60 }
 0x219   : > { %1046 = vmatprep.mubr.f32.mxu1 %v1366_v0 }
 0x21c   : > { %1305 = vmatmul.mubr.msk.f32.gmra.mxu1 %vm951_vm2, %v926_v18 }
 0x21d   : > { %1135 = vmatprep.mubr.f32.mxu1 %v1366_v0 }
 0x2d0   : > { %v1030_v59 = vpop.f32.mrf.mxu1 }
 0x2d1   : > { %v1031_v50 = vadd.f32 %v1030_v59, %v934_v52 }
 0x2d2   : > { %v1032_v19 = vpop.f32.mrf.mxu1 }
 0x2d3   : > { %v1033_v51 = vadd.f32 %v1032_v19, %v934_v52  ;;  %v1053_v48 = vmax.f32 %v1031_v50, 0.0 }
 0x2d4   : > { %v1036_v20 = vpop.f32.mrf.mxu1 }
 0x2d5   : > { %v1037_v29 = vadd.f32 %v1036_v20, %v939_v26  ;;  %v1054_v33 = vmax.f32 %v1033_v51, 0.0 }
 0x2d6   : > { %v1038_v58 = vpop.f32.mrf.mxu1 }
 0x2d7   : > { %v1039_v27 = vadd.f32 %v1038_v58, %v939_v26  ;;  %v1055_v32 = vmax.f32 %v1037_v29, 0.0 }
 0x2d8   : > { %v1042_v21 = vpop.f32.mrf.mxu1 }
 0x2d9   : > { %v1043_v53 = vadd.f32 %v1042_v21, %v944_v56  ;;  %v1056_v49 = vmax.f32 %v1039_v27, 0.0 }
 0x2da   : > { %v1044_v22 = vpop.f32.mrf.mxu1 }
 0x2db   : > { %v1045_v25 = vadd.f32 %v1044_v22, %v944_v56  ;;  %v1057_v31 = vmax.f32 %v1043_v53, 0.0 }
 0x2dc   : > { %v1048_v23 = vpop.f32.mrf.mxu1 }
 0x2dd   : > { %v1049_v55 = vadd.f32 %v1048_v23, %v949_v57  ;;  %v1058_v30 = vmax.f32 %v1045_v25, 0.0 }
 0x2de   : > { %v1050_v24 = vpop.f32.mrf.mxu1 }
 0x2df   : > { %v1051_v54 = vadd.f32 %v1050_v24, %v949_v57  ;;  %v1059_v0 = vmax.f32 %v1049_v55, 0.0 }
 0x2e1   : > { %v1060_v28 = vmax.f32 %v1051_v54, 0.0 }
 0x2e3   : > { %1095 = vmatprep.subr.mxu1 %v1060_v28 }
 0x2e4   : > { %1096 = vmatpush1.msra.mxu1 %v1059_v0 }
 0x2e5   : > { %1097 = vmatprep.subr.mxu1 %v1058_v30 }
 0x2e6   : > { %1098 = vmatpush1.msra.mxu1 %v1057_v31 }
 0x2e7   : > { %1099 = vmatprep.subr.mxu1 %v1056_v49 }
 0x2e8   : > { %1100 = vmatpush1.msra.mxu1 %v1055_v32 }
 0x2e9   : > { %1101 = vmatprep.subr.mxu1 %v1054_v33 }
 0x2ea   : > { %1102 = vmatpush1.msra.mxu1 %v1053_v48 }
 0x2eb   : > { %1306 = vmatmul.mubr.msk.f32.vlgmr.msra.gmra.mxu1 %vm951_vm2, %v1061_v47 }
 0x3ab   : > { %v1137_v34 = vpop.f32.mrf.mxu1 }
 0x3ac   : > { %v1138_v35 = vadd.f32 %v1137_v34, %v1066_v46 }
 0x3ad   : > { %v1139_v37 = vpop.f32.mrf.mxu1 }
 0x3ae   : > { %v1140_v38 = vadd.f32 %v1139_v37, %v1066_v46  ;;  %v1154_v39 = vadd.f32 %v1307_v45, %v1138_v35 }
 0x3b0   : > { %v1155_v40 = vadd.f32 %v1151_v36, %v1140_v38 }
 0x3b2   : > { %v1158_v41 = vcombine.low %v1154_v39, %v1155_v40 }
 0x3b4   : > { %1308 = vst.sshfl [vmem:[%s433_s11] sm:$0x33 pattern:$0x76325410] %v1158_v41 }
 0x3b5 PF: > { %s20_s15 = sadd.s32 1, %s1364_s15   ;;  %s1718_s13 = smov %s1360_s14 }
 0x3b6   : > { %p17_p5 = scmp.ge.s32.totalorder %s20_s15, 4   ;;  %s1719_s14 = smov %s1721_s16 }
 0x3b8   :  { %19 = sbr.rel (!%p17_p5) target bundleno = 2 (0x2), region = 93 }

</bundles_post_ra>
